<compile_context>
chip_gen: v5e
topology: v5e:2x2
jax: 0.10.0
libtpu: 0.0.40
codegen_flags: <defaults>
</compile_context>

<pallas_src>
import numpy as np
import jax
import jax.numpy as jnp
from jax.experimental import pallas as pl
from jax.experimental.pallas import tpu as pltpu

EPS = 1e-07

# ---- config (the fields FrontEndAug actually uses on the forward hot path) ----
N_FFT = 128
HOP_LENGTH = 64                   # == N_FFT // 2  -> frame t = [half_t, half_{t+1}]
SR = 8000
F_MIN = 0.0
F_MAX = 4000.0
N_MELS = 32
POWER = 2.0
N_FREQ = N_FFT // 2 + 1           # onesided spectrogram bins (65)
PF = 128                          # freq bins zero-padded to a full 128-lane tile


# ---------------- deterministic parameter construction (host / numpy) ----------------
def hann_window(n_fft: int) -> np.ndarray:
    # torch.hann_window(n_fft, periodic=True)
    k = np.arange(n_fft)
    return (0.5 * (1.0 - np.cos(2.0 * np.pi * k / n_fft))).astype(np.float32)


def dft_matrices(n_fft: int, n_freq: int):
    # real/imag parts of the onesided DFT:  X[k] = sum_n x[n] e^{-2 pi i k n / N}
    n = np.arange(n_fft)[:, None].astype(np.float64)
    k = np.arange(n_freq)[None, :].astype(np.float64)
    ang = 2.0 * np.pi * n * k / n_fft
    return np.cos(ang).astype(np.float32), (-np.sin(ang)).astype(np.float32)


def mel_filterbank(n_freq: int, f_min: float, f_max: float, n_mels: int, sr: int):
    # torchaudio.transforms.MelScale defaults: mel_scale="htk", norm=None
    def hz_to_mel(f):
        return 2595.0 * np.log10(1.0 + f / 700.0)

    def mel_to_hz(m):
        return 700.0 * (10.0 ** (m / 2595.0) - 1.0)

    all_freqs = np.linspace(0.0, sr / 2.0, n_freq)
    m_pts = np.linspace(hz_to_mel(f_min), hz_to_mel(f_max), n_mels + 2)
    f_pts = mel_to_hz(m_pts)
    f_diff = f_pts[1:] - f_pts[:-1]                       # (n_mels+1,)
    slopes = f_pts[None, :] - all_freqs[:, None]          # (n_freq, n_mels+2)
    down = -slopes[:, :-2] / f_diff[:-1]
    up = slopes[:, 2:] / f_diff[1:]
    fb = np.maximum(0.0, np.minimum(down, up))
    return fb.astype(np.float32)                          # (n_freq, n_mels)


def build_constants():
    """Windowed, merged DFT basis (128, 256) bf16 and zero-padded mel filterbank (128, 32) f32."""
    win = hann_window(N_FFT)                               # (128,)
    cos_m, sin_m = dft_matrices(N_FFT, N_FREQ)             # (128, 65) each, sin already negated
    wc = np.zeros((N_FFT, 2 * PF), np.float32)
    wc[:, :N_FREQ] = win[:, None] * cos_m                  # lanes   0.. 64: windowed cos
    wc[:, PF:PF + N_FREQ] = win[:, None] * sin_m           # lanes 128..192: windowed -sin
    fb = mel_filterbank(N_FREQ, F_MIN, F_MAX, N_MELS, SR)  # (65, 32)
    fb_pad = np.zeros((PF, N_MELS), np.float32)
    fb_pad[:N_FREQ] = fb
    # bf16 MXU multiplicand for the DFT dot; mel filterbank stays f32.
    return jnp.asarray(wc).astype(jnp.bfloat16), jnp.asarray(fb_pad)


# ------------------------------- Pallas kernel --------------------------------
def frontend_kernel(fr_ref, wc_ref, fb_ref, out_ref):
    """One (batch, time-tile) grid step.

    fr_ref : (1, TQ, 128) bf16  hann-frame samples (frame t = [half_t, half_{t+1}])
    wc_ref : (128, 256)   bf16  hann-windowed [cos | sin] DFT basis, zero-padded to 128 lanes each
    fb_ref : (128, 32)    f32   mel filterbank, freq axis zero-padded to 128
    out_ref: (1, 32, TQ)  f32   log-mel (mel-major -> lane-dense stores along time)
    """
    frames = fr_ref[0]                                                        # (TQ, 128) bf16
    spec = jnp.dot(frames, wc_ref[...], preferred_element_type=jnp.float32)   # (TQ, 256) f32
    re = spec[:, :PF]                                                         # (TQ, 128)
    im = spec[:, PF:]                                                         # (TQ, 128)
    pw = re * re + im * im                                                    # |STFT|**2, f32
    mel = jnp.dot(pw, fb_ref[...], preferred_element_type=jnp.float32)        # (TQ, 32) f32
    out_ref[0] = jnp.log(mel + EPS).T                                         # (32, TQ)


# --------------------------------- wrapper ------------------------------------
def frontend_aug(x, y, tile_t=2048):
    """x: (B, num_samples) float32 waveform; y: passed through unchanged."""
    B, num_samples = x.shape
    T = num_samples // HOP_LENGTH + 1                     # torch Spectrogram(center=True)

    # ---- time tiling -------------------------------------------------------
    T8 = ((T + 7) // 8) * 8                               # sublane-rounded frame count
    tile_t = max(128, (tile_t // 128) * 128)              # tiled out lane dim must be 128-aligned
    TQ = min(tile_t, T8)
    if B == 1 and TQ == T8 and T8 > 256:
        # Split time into >= 2 'parallel' tiles so both v7x TensorCores get work.
        TQ = ((-(-T8 // 2)) + 127) // 128 * 128
    TT = -(-T // TQ)                                      # number of time tiles
    Tpad = TT * TQ

    # ---- frame assembly (reflect pad, hop-64 halves -> lane-dense 128-wide frames) ----
    xp = jnp.pad(x, ((0, 0), (N_FFT // 2, N_FFT // 2)), mode="reflect")
    halves = xp[:, :(T + 1) * HOP_LENGTH].reshape(B, T + 1, HOP_LENGTH)       # (B, T+1, 64)
    frames = jnp.concatenate([halves[:, :T], halves[:, 1:T + 1]], axis=-1)    # (B, T, 128)
    frames = jnp.pad(frames, ((0, 0), (0, Tpad - T), (0, 0)))                 # (B, Tpad, 128)
    frames = frames.astype(jnp.bfloat16)                  # halve the dominant HBM input stream

    wc, fb = build_constants()                            # (128, 256) bf16, (128, 32) f32

    out = pl.pallas_call(
        frontend_kernel,
        out_shape=jax.ShapeDtypeStruct((B, N_MELS, Tpad), jnp.float32),
        grid_spec=pltpu.PrefetchScalarGridSpec(
            num_scalar_prefetch=0,
            grid=(B, TT),
            in_specs=[
                pl.BlockSpec((1, TQ, N_FFT), lambda b, t: (b, t, 0)),
                pl.BlockSpec((N_FFT, 2 * PF), lambda b, t: (0, 0)),   # resident constant
                pl.BlockSpec((PF, N_MELS), lambda b, t: (0, 0)),      # resident constant
            ],
            out_specs=pl.BlockSpec((1, N_MELS, TQ), lambda b, t: (b, 0, t)),
        ),
        compiler_params=pltpu.CompilerParams(
            dimension_semantics=("parallel", "parallel"),
            vmem_limit_bytes=32 * 1024 * 1024,            # headroom for tile_t=4096 (v5e default is 16 MiB)
        ),
    )(frames, wc, fb)

    # drop time padding; already in PyTorch layout (B, n_mels, T)
    x_out = out[:, :, :T]
    ts_rate = -1                                          # no timestretch on this path
    return x_out, y, ts_rate


# ------------------------- pure-JAX reference (for checking) -------------------------
def frontend_ref(x, bf16_matmul_inputs=False):
    """Reference log-mel. With bf16_matmul_inputs=True the DFT-dot multiplicands are
    rounded to bf16 exactly like the kernel's, isolating implementation error from
    the intentional bf16 quantization."""
    B, num_samples = x.shape
    T = num_samples // HOP_LENGTH + 1
    xp = jnp.pad(x, ((0, 0), (N_FFT // 2, N_FFT // 2)), mode="reflect")
    idx = jnp.arange(T)[:, None] * HOP_LENGTH + jnp.arange(N_FFT)[None, :]
    frames = xp[:, idx]                                   # (B, T, 128)
    win = jnp.asarray(hann_window(N_FFT))
    cos_m, sin_m = dft_matrices(N_FFT, N_FREQ)
    fbank = jnp.asarray(mel_filterbank(N_FREQ, F_MIN, F_MAX, N_MELS, SR))
    wcos = jnp.asarray(cos_m) * win[:, None]
    wsin = jnp.asarray(sin_m) * win[:, None]
    if bf16_matmul_inputs:
        frames = frames.astype(jnp.bfloat16)
        wcos = wcos.astype(jnp.bfloat16)
        wsin = wsin.astype(jnp.bfloat16)
    hi = jax.lax.Precision.HIGHEST
    re = jnp.einsum("btn,nf->btf", frames, wcos,
                    preferred_element_type=jnp.float32, precision=hi)
    im = jnp.einsum("btn,nf->btf", frames, wsin,
                    preferred_element_type=jnp.float32, precision=hi)
    mel = jnp.einsum("btf,fm->btm", re * re + im * im, fbank, precision=hi)
    return jnp.transpose(jnp.log(mel + EPS), (0, 2, 1))   # (B, n_mels, T)


# ----------------------------------- main --------------------------------------
if __name__ == "__main__":
    key = jax.random.PRNGKey(0)
    kx, ky = jax.random.split(key)
    B, NUM_SAMPLES = 2, 1024
    x = 0.1 * jax.random.normal(kx, (B, NUM_SAMPLES), dtype=jnp.float32)
    y = jax.random.normal(ky, (B, 8), dtype=jnp.float32)     # passthrough target

    log_mel, y_out, ts_rate = frontend_aug(x, y)
    jax.block_until_ready(log_mel)
    jax.block_until_ready(y_out)

    expected_T = NUM_SAMPLES // HOP_LENGTH + 1
    assert log_mel.shape == (B, N_MELS, expected_T), log_mel.shape
    assert bool(jnp.all(jnp.isfinite(log_mel)))

    # (1) Implementation check: against a reference whose DFT-dot inputs are rounded to
    #     bf16 exactly like the kernel's MXU multiplicands. Any framing / DFT / mel /
    #     transpose bug would blow far past this bound.
    ref_q = frontend_ref(x, bf16_matmul_inputs=True)
    impl_err = float(jnp.max(jnp.abs(log_mel - ref_q)))
    assert impl_err < 1e-2, f"kernel vs same-precision reference: max abs err {impl_err}"

    # (2) Numerics check vs the full-f32 reference: bf16 multiplicands give ~1e-3 typical
    #     log-mel error; rare low-energy bins amplify relative error in log space, so the
    #     hard bound on the max is generous and the tight bound is on the mean.
    ref_f32 = frontend_ref(x)
    mean_err = float(jnp.mean(jnp.abs(log_mel - ref_f32)))
    max_err = float(jnp.max(jnp.abs(log_mel - ref_f32)))
    assert mean_err < 1e-2, f"mean abs err vs f32 reference: {mean_err}"
    assert max_err < 1.0, f"max abs err vs f32 reference: {max_err}"

    print("KERNEL_OK")
</pallas_src>

<mosaic_0001>
module attributes {stable_mosaic.version = 11 : i64} {
  func.func @frontend_kernel(%arg0: i32, %arg1: i32, %arg2: memref<1x24x128xbf16, #tpu.memory_space<vmem>>, %arg3: memref<128x256xbf16, #tpu.memory_space<vmem>>, %arg4: memref<128x32xf32, #tpu.memory_space<vmem>>, %arg5: memref<1x32x24xf32, #tpu.memory_space<vmem>>) attributes {dimension_semantics = [#tpu.dimension_semantics<parallel>, #tpu.dimension_semantics<parallel>], iteration_bounds = array<i64: 2, 1>, scalar_prefetch = 0 : i64, scratch_operands = 0 : i64, tpu.core_type = #tpu.core_type<tc>, window_params = [{transform_indices = @transform_0, window_bounds = array<i64: 1, 24, 128>}, {pipeline_mode = #tpu.pipeline_mode<synchronous>, transform_indices = @transform_1, window_bounds = array<i64: 128, 256>}, {pipeline_mode = #tpu.pipeline_mode<synchronous>, transform_indices = @transform_2, window_bounds = array<i64: 128, 32>}, {transform_indices = @transform_3, window_bounds = array<i64: 1, 32, 24>}]} {
    %c0 = arith.constant 0 : index
    %c0_0 = arith.constant 0 : index
    %c0_1 = arith.constant 0 : index
    %0 = vector.load %arg2[%c0, %c0_0, %c0_1] : memref<1x24x128xbf16, #tpu.memory_space<vmem>>, vector<1x24x128xbf16>
    %1 = vector.shape_cast %0 : vector<1x24x128xbf16> to vector<24x128xbf16>
    %c0_2 = arith.constant 0 : index
    %c0_3 = arith.constant 0 : index
    %2 = vector.load %arg3[%c0_2, %c0_3] : memref<128x256xbf16, #tpu.memory_space<vmem>>, vector<128x256xbf16>
    %cst = arith.constant dense<0.000000e+00> : vector<24x256xf32>
    %3 = tpu.matmul %1, %2, %cst {dimension_numbers = #tpu.dot_dimension_numbers<[1], [0], [0], [1], [0, 0, 1, 1], [], []>} : vector<24x128xbf16>, vector<128x256xbf16>, vector<24x256xf32> -> vector<24x256xf32>
    %4 = vector.extract_strided_slice %3 {offsets = [0, 0], sizes = [24, 128], strides = [1, 1]} : vector<24x256xf32> to vector<24x128xf32>
    %5 = vector.extract_strided_slice %3 {offsets = [0, 128], sizes = [24, 128], strides = [1, 1]} : vector<24x256xf32> to vector<24x128xf32>
    %6 = arith.mulf %4, %4 : vector<24x128xf32>
    %7 = arith.mulf %5, %5 : vector<24x128xf32>
    %8 = arith.addf %6, %7 : vector<24x128xf32>
    %c0_4 = arith.constant 0 : index
    %c0_5 = arith.constant 0 : index
    %9 = vector.load %arg4[%c0_4, %c0_5] : memref<128x32xf32, #tpu.memory_space<vmem>>, vector<128x32xf32>
    %cst_6 = arith.constant dense<0.000000e+00> : vector<24x32xf32>
    %10 = tpu.matmul %8, %9, %cst_6 {dimension_numbers = #tpu.dot_dimension_numbers<[1], [0], [0], [1], [0, 0, 1, 1], [], []>} : vector<24x128xf32>, vector<128x32xf32>, vector<24x32xf32> -> vector<24x32xf32>
    %cst_7 = arith.constant 1.000000e-07 : f32
    %11 = vector.broadcast %cst_7 : f32 to vector<24x32xf32>
    %12 = arith.addf %10, %11 : vector<24x32xf32>
    %13 = math.log %12 : vector<24x32xf32>
    %14 = tpu.transpose %13, [1, 0] : vector<24x32xf32> -> vector<32x24xf32>
    %c0_8 = arith.constant 0 : index
    %c0_9 = arith.constant 0 : index
    %c0_10 = arith.constant 0 : index
    %15 = vector.load %arg5[%c0_8, %c0_9, %c0_10] : memref<1x32x24xf32, #tpu.memory_space<vmem>>, vector<1x32x24xf32>
    %16 = vector.shape_cast %15 : vector<1x32x24xf32> to vector<32x24xf32>
    %17 = vector.shape_cast %14 : vector<32x24xf32> to vector<1x32x24xf32>
    tpu.vector_store %arg5[%c0_8, %c0_9, %c0_10], %17 {strides = array<i32>} : memref<1x32x24xf32, #tpu.memory_space<vmem>>, vector<1x32x24xf32>,
    return
  }
  func.func @transform_0(%arg0: i32, %arg1: i32) -> (i32, i32, i32) {
    %c0_i32 = arith.constant 0 : i32
    %c0_i32_0 = arith.constant 0 : i32
    return %arg0, %arg1, %c0_i32 : i32, i32, i32
  }
  func.func @transform_1(%arg0: i32, %arg1: i32) -> (i32, i32) {
    %c0_i32 = arith.constant 0 : i32
    %c0_i32_0 = arith.constant 0 : i32
    %c0_i32_1 = arith.constant 0 : i32
    return %c0_i32, %c0_i32_0 : i32, i32
  }
  func.func @transform_2(%arg0: i32, %arg1: i32) -> (i32, i32) {
    %c0_i32 = arith.constant 0 : i32
    %c0_i32_0 = arith.constant 0 : i32
    %c0_i32_1 = arith.constant 0 : i32
    return %c0_i32, %c0_i32_0 : i32, i32
  }
  func.func @transform_3(%arg0: i32, %arg1: i32) -> (i32, i32, i32) {
    %c0_i32 = arith.constant 0 : i32
    %c0_i32_0 = arith.constant 0 : i32
    return %arg0, %c0_i32, %arg1 : i32, i32, i32
  }
}

</mosaic_0001>

<bundles_post_ra>
// kernel: tpu_custom_call.1
= control target key start
LH: loop header
LB: loop body
LE: loop exit
PB: predicated region body
PF: predicated region fallthrough
CT: control target
= control target key end

     0   :  { %s709_s12 = smov 0   ;;  %s711_s13 = smov 0   ;;  %s894_s0 = inlined_call_operand.vmem [shape: bf16[2,24,128], index: 0, kind: input, shape index: {}]   ;;  %s895_s1 = inlined_call_operand.vmem [shape: bf16[128,256], index: 1, kind: input, shape index: {}]   ;;  %s896_s2 = inlined_call_operand.vmem [shape: f32[128,32], index: 2, kind: input, shape index: {}]   ;;  %s897_s3 = inlined_call_operand.vmem [shape: f32[2,32,24], index: 3, kind: output, shape index: {}]  }
   0x1   :  { %s713_s14 = smov 0  }
   0x2 LB: > { %s25_s15 = sadd.s32 1, %s683_s13  ;;  %p533_p0 = scmp.ge.s32.totalorder %s687_s14, 1  ;;  %s687_s14 = sphi %s713_s14, %s13_s14   ;;  %s683_s13 = sphi %s711_s13, %s899_s13   ;;  %s679_s12 = sphi %s709_s12, %s898_s12  }
   0x3   : > { %p27_p1 = scmp.ge.s32.totalorder %s25_s15, 2  ;;  %p158_p2 = scmp.lt.s32.totalorder %s687_s14, 3 }
   0x5   : > { %s901_s15 = smov (%p27_p1, %s25_s15), 0  ;;  %p159_p3 = pnand %p533_p0, %p158_p2 }
   0x6   : > { %p190_p4 = scmp.lt.s32.totalorder (!%p159_p3), %s679_s12, 1 }
   0x7   : > { %162 = sbr.rel (%p159_p3) target bundleno = 510 (0x1fe), region = 32 }
   0xc   : > { %v599_v0 = vld [vmem:[%s895_s1 + $0x70] sm:$0xf]  ;;  %v624_v1 = vld [vmem:[%s895_s1 + $0x74] sm:$0xf0]  ;;  %v623_v2 = vld [vmem:[%s895_s1 + $0x74] sm:$0xf] }
   0xd   : > { %v600_v3 = vor.u32 %v624_v1, %v599_v0  ;;  %v601_v4 = vld [vmem:[%s895_s1 + $0x78] sm:$0xf0]  ;;  %v591_v5 = vld [vmem:[%s895_s1 + $0x60] sm:$0xf]  ;;  %v622_v6 = vld [vmem:[%s895_s1 + $0x64] sm:$0xf0] }
   0xe   : > { %v604_v7 = vor.u32 %v623_v2, %v601_v4  ;;  %v621_v8 = vld [vmem:[%s895_s1 + $0x64] sm:$0xf]  ;;  %v593_v9 = vld [vmem:[%s895_s1 + $0x68] sm:$0xf0]  ;;  %v592_v10 = vor.u32 %v622_v6, %v591_v5  ;;  %v583_v12 = vld [vmem:[%s895_s1 + $0x50] sm:$0xf] }
   0xf   : > { %316 = vmatpush.bf16.msra.mxu0 %v600_v3  ;;  %625 = vmatpush.bf16.msra.mxu3 %v600_v3  ;;  %v596_v11 = vor.u32 %v621_v8, %v593_v9  ;;  %v620_v13 = vld [vmem:[%s895_s1 + $0x54] sm:$0xf0]  ;;  %v619_v14 = vld [vmem:[%s895_s1 + $0x54] sm:$0xf]  ;;  %v585_v15 = vld [vmem:[%s895_s1 + $0x58] sm:$0xf0] }
  0x10   : > { %334 = vmatpush.bf16.msra.mxu1 %v604_v7  ;;  %v584_v16 = vor.u32 %v620_v13, %v583_v12  ;;  %v588_v17 = vor.u32 %v619_v14, %v585_v15  ;;  %v575_v18 = vld [vmem:[%s895_s1 + $0x40] sm:$0xf]  ;;  %v618_v19 = vld [vmem:[%s895_s1 + $0x44] sm:$0xf0]  ;;  %v617_v20 = vld [vmem:[%s895_s1 + $0x44] sm:$0xf] }
  0x11   : > { %v577_v21 = vld [vmem:[%s895_s1 + $0x48] sm:$0xf0]  ;;  %v576_v22 = vor.u32 %v618_v19, %v575_v18  ;;  %v567_v24 = vld [vmem:[%s895_s1 + $0x30] sm:$0xf]  ;;  %v616_v25 = vld [vmem:[%s895_s1 + $0x34] sm:$0xf0] }
  0x12   : > { %v580_v23 = vor.u32 %v617_v20, %v577_v21  ;;  %s903_s12 = smov (!%p190_p4, %s679_s12), 1  ;;  %v615_v26 = vld [vmem:[%s895_s1 + $0x34] sm:$0xf]  ;;  %v569_v27 = vld [vmem:[%s895_s1 + $0x38] sm:$0xf0]  ;;  %v568_v28 = vor.u32 %v616_v25, %v567_v24  ;;  %v374_v42 = vld [vmem:[%s896_s2 + $0x68] sm:$0xff] }
  0x13   : > { %317 = vmatpush.bf16.msra.mxu0 %v592_v10  ;;  %626 = vmatpush.bf16.msra.mxu3 %v592_v10  ;;  %v572_v29 = vor.u32 %v615_v26, %v569_v27  ;;  %v559_v30 = vld [vmem:[%s895_s1 + $0x20] sm:$0xf]  ;;  %v614_v31 = vld [vmem:[%s895_s1 + $0x24] sm:$0xf0]  ;;  %s633_s10 = smul.u32 12, %s903_s12  ;;  %v376_v35 = vld [vmem:[%s896_s2 + $0x78] sm:$0xff] }
  0x14   : > { %335 = vmatpush.bf16.msra.mxu1 %v596_v11  ;;  %v613_v32 = vld [vmem:[%s895_s1 + $0x24] sm:$0xf]  ;;  %v561_v33 = vld [vmem:[%s895_s1 + $0x28] sm:$0xf0]  ;;  %v560_v34 = vor.u32 %v614_v31, %v559_v30  ;;  %v375_v36 = vld [vmem:[%s896_s2 + $0x70] sm:$0xff]  ;;  %377 = vmatpush.msra.mxu2 %v376_v35  ;;  %s607_s24 = sshll.u32 %s903_s12, 5 }
  0x15   : > { %v564_v37 = vor.u32 %v613_v32, %v561_v33  ;;  %v551_v38 = vld [vmem:[%s895_s1 + $0x10] sm:$0xf]  ;;  %v612_v39 = vld [vmem:[%s895_s1 + $0x14] sm:$0xf0]  ;;  %s197_s29 = scalar_lea.vmem %s894_s0, %s633_s10  ;;  %v611_v40 = vld [vmem:[%s895_s1 + $0x14] sm:$0xf]  ;;  %s206_s27 = scalar_lea.vmem %s897_s3, %s607_s24 }
  0x16   : > { %v553_v41 = vld [vmem:[%s895_s1 + $0x18] sm:$0xf0]  ;;  %378 = vmatpush.msra.mxu2 %v375_v36  ;;  %v552_v43 = vor.u32 %v612_v39, %v551_v38  ;;  %v209_v44 = vld [vmem:[%s197_s29 + $0x8] sm:$0xf]  ;;  %v373_v45 = vld [vmem:[%s896_s2 + $0x60] sm:$0xff]  ;;  %vm441_vm0 = vcmask 195584  }
  0x17   : > { %318 = vmatpush.bf16.msra.mxu0 %v584_v16  ;;  %627 = vmatpush.bf16.msra.mxu3 %v584_v16  ;;  %v556_v46 = vor.u32 %v611_v40, %v553_v41  ;;  %v543_v47 = vld [vmem:[%s895_s1] sm:$0xf]  ;;  %v610_v48 = vld [vmem:[%s895_s1 + $0x4] sm:$0xf0]  ;;  %v609_v49 = vld [vmem:[%s895_s1 + $0x4] sm:$0xf]  ;;  %v231_v52 = vunpack.c.l.b16 %v209_v44 }
  0x18   : > { %336 = vmatpush.bf16.msra.mxu1 %v588_v17  ;;  %379 = vmatpush.msra.mxu2 %v374_v42  ;;  %v545_v50 = vld [vmem:[%s895_s1 + $0x8] sm:$0xf0]  ;;  %v372_v51 = vld [vmem:[%s896_s2 + $0x58] sm:$0xff]  ;;  %v544_v53 = vor.u32 %v610_v48, %v543_v47  ;;  %v371_v54 = vld [vmem:[%s896_s2 + $0x50] sm:$0xff] }
  0x19   : > { %v548_v55 = vor.u32 %v609_v49, %v545_v50  ;;  %v370_v56 = vld [vmem:[%s896_s2 + $0x48] sm:$0xff]  ;;  %v608_v57 = vld [vmem:[%s197_s29] sm:$0xff]  ;;  %v233_v58 = vpack.c.b16 %v231_v52, %v231_v52  ;;  %v368_v60 = vld [vmem:[%s896_s2 + $0x38] sm:$0xff] }
  0x1a   : > { %380 = vmatpush.msra.mxu2 %v373_v45  ;;  %v369_v59 = vld [vmem:[%s896_s2 + $0x40] sm:$0xff]  ;;  %v367_v61 = vld [vmem:[%s896_s2 + $0x30] sm:$0xff]  ;;  %v366_v62 = vld [vmem:[%s896_s2 + $0x28] sm:$0xff] }
  0x1b   : > { %319 = vmatpush.bf16.msra.mxu0 %v576_v22  ;;  %628 = vmatpush.bf16.msra.mxu3 %v576_v22  ;;  %v365_v63 = vld [vmem:[%s896_s2 + $0x20] sm:$0xff]  ;;  %v364_v0 = vld [vmem:[%s896_s2 + $0x18] sm:$0xff]  ;;  %v363_v1 = vld [vmem:[%s896_s2 + $0x10] sm:$0xff] }
  0x1c   : > { %337 = vmatpush.bf16.msra.mxu1 %v580_v23  ;;  %381 = vmatpush.msra.mxu2 %v372_v51  ;;  %v362_v2 = vld [vmem:[%s896_s2 + $0x8] sm:$0xff]  ;;  %v361_v3 = vld [vmem:[%s896_s2] sm:$0xff] }
  0x1e   : > { %382 = vmatpush.msra.mxu2 %v371_v54 }
  0x1f   : > { %320 = vmatpush.bf16.msra.mxu0 %v568_v28  ;;  %629 = vmatpush.bf16.msra.mxu3 %v568_v28 }
  0x20   : > { %338 = vmatpush.bf16.msra.mxu1 %v572_v29  ;;  %383 = vmatpush.msra.mxu2 %v370_v56 }
  0x22   : > { %384 = vmatpush.msra.mxu2 %v369_v59 }
  0x23   : > { %321 = vmatpush.bf16.msra.mxu0 %v560_v34  ;;  %630 = vmatpush.bf16.msra.mxu3 %v560_v34 }
  0x24   : > { %339 = vmatpush.bf16.msra.mxu1 %v564_v37  ;;  %385 = vmatpush.msra.mxu2 %v368_v60 }
  0x26   : > { %386 = vmatpush.msra.mxu2 %v367_v61 }
  0x27   : > { %322 = vmatpush.bf16.msra.mxu0 %v552_v43  ;;  %631 = vmatpush.bf16.msra.mxu3 %v552_v43 }
  0x28   : > { %340 = vmatpush.bf16.msra.mxu1 %v556_v46  ;;  %387 = vmatpush.msra.mxu2 %v366_v62 }
  0x2a   : > { %388 = vmatpush.msra.mxu2 %v365_v63 }
  0x2b   : > { %323 = vmatpush.bf16.msra.mxu0 %v544_v53  ;;  %632 = vmatpush.bf16.msra.mxu3 %v544_v53 }
  0x2c   : > { %341 = vmatpush.bf16.msra.mxu1 %v548_v55  ;;  %389 = vmatpush.msra.mxu2 %v364_v0 }
  0x2e   : > { %324 = vmatmul.bf16.vlgmr.msra.gmra.mxu0 %v608_v57  ;;  %329 = vmatmul.bf16.vlgmr.msra.gmra.mxu3 %v233_v58 }
  0x2f   : > { %342 = vmatmul.bf16.vlgmr.msra.gmra.mxu1 %v608_v57  ;;  %390 = vmatpush.msra.mxu2 %v363_v1 }
  0x31   : > { %391 = vmatpush.msra.mxu2 %v362_v2 }
  0x33   : > { %392 = vmatpush.msra.mxu2 %v361_v3 }
  0x3f   : > { %347 = vmatmul.bf16.gmra.mxu1 %v233_v58 }
  0xab   : > { %v325_v4 = vpop.f32.mrf.mxu0 }
  0xac   : > { %v352_v5 = vmul.f32 %v325_v4, %v325_v4  ;;  %v343_v6 = vpop.f32.mrf.mxu1 }
  0xad   : > { %v355_v7 = vmul.f32 %v343_v6, %v343_v6 }
  0xaf   : > { %v358_v8 = vadd.f32 %v355_v7, %v352_v5 }
  0xb1   : > { %393 = vmatmul.f32.vlgmr.msra.gmra.mxu2 %v358_v8  ;;  %v330_v9 = vpop.f32.mrf.mxu3 }
  0xb2   : > { %v354_v16 = vmul.f32 %v330_v9, %v330_v9 }
  0xb3   : > { %v327_v10 = vpop.f32.mrf.mxu0 }
  0xb4   : > { %v353_v11 = vmul.f32 %v327_v10, %v327_v10  ;;  %v345_v12 = vpop.f32.mrf.mxu1 }
  0xb5   : > { %v356_v13 = vmul.f32 %v345_v12, %v345_v12 }
  0xb7   : > { %v359_v14 = vadd.f32 %v356_v13, %v353_v11 }
  0xb9   : > { %396 = vmatmul.f32.gmra.mxu2 %v359_v14  ;;  %v332_v15 = vpop.f32.mrf.mxu3 }
  0xbc   : > { %v348_v17 = vpop.f32.mrf.mxu1 }
  0xbd   : > { %v357_v18 = vmul.f32 %v348_v17, %v348_v17 }
  0xbf   : > { %v360_v19 = vadd.f32 %v357_v18, %v354_v16 }
  0xc1   : > { %399 = vmatmul.f32.gmra.mxu2 %v360_v19 }
  0xc4   : > { %v350_v20 = vpop.f32.mrf.mxu1 }
 0x134   : > { %v394_v21 = vpop.f32.mrf.mxu2 }
 0x135   : > { %v395_v22 = vadd.f32 1e-07, %v394_v21 }
 0x137   : > { %659 = vlog2.f32 %v395_v22 }
 0x13c   : > { %v397_v23 = vpop.f32.mrf.mxu2 }
 0x13d   : > { %v660_v24 = vpop.eup %659  ;;  %v398_v25 = vadd.f32 1e-07, %v397_v23 }
 0x13e   : > { %v404_v26 = vmul.f32 0.6931472, %v660_v24 }
 0x13f   : > { %661 = vlog2.f32 %v398_v25 }
 0x140   : > { %409 = vxpose.xlu0.b32.start [1/3] (short) (narrow) %v404_v26, 32 }
 0x144   : > { %v400_v27 = vpop.f32.mrf.mxu2 }
 0x145   : > { %v662_v28 = vpop.eup %661  ;;  %v401_v29 = vadd.f32 1e-07, %v400_v27 }
 0x146   : > { %v406_v30 = vmul.f32 0.6931472, %v662_v28 }
 0x147   : > { %663 = vlog2.f32 %v401_v29 }
 0x148   : > { %410 = vxpose.xlu0.b32.cont [2/3] (short) (narrow) %v406_v30, 32 }
 0x14d   : > { %v664_v31 = vpop.eup %663 }
 0x14e   : > { %v408_v32 = vmul.f32 0.6931472, %v664_v31 }
 0x150   : > { %411 = vxpose.xlu0.b32.end [3/3] (short) (narrow) %v408_v32, 32 }
 0x1e4   : > { %v425_v33 = vpop.trf.xlu0 }
 0x1e5   : > { %442 = vst.msk [vmem:[%s206_s27] sm:$0xff] %vm441_vm0, %v425_v33 }
 0x1ec   : > { %v426_v34 = vpop.trf.xlu0 }
 0x1ed   : > { %443 = vst.msk [vmem:[%s206_s27 + $0x8] sm:$0xff] %vm441_vm0, %v426_v34 }
 0x1f4   : > { %v427_v35 = vpop.trf.xlu0 }
 0x1f5   : > { %444 = vst.msk [vmem:[%s206_s27 + $0x10] sm:$0xff] %vm441_vm0, %v427_v35 }
 0x1fc   : > { %v428_v36 = vpop.trf.xlu0 }
 0x1fd   : > { %445 = vst.msk [vmem:[%s206_s27 + $0x18] sm:$0xff] %vm441_vm0, %v428_v36 }
 0x1fe PF: > { %s13_s14 = sadd.s32 1, %s687_s14   ;;  %s898_s12 = smov %s683_s13 }
 0x1ff   : > { %p10_p5 = scmp.ge.s32.totalorder %s13_s14, 4   ;;  %s899_s13 = smov %s901_s15 }
 0x201   :  { %12 = sbr.rel (!%p10_p5) target bundleno = 2 (0x2), region = 62 }

</bundles_post_ra>
